<compile_context>
chip_gen: v6e
topology: v6e:2x2x1
jax: 0.10.0
libtpu: 0.0.40
codegen_flags: <defaults>
</compile_context>

<pallas_src>
import jax
import jax.numpy as jnp
from jax.experimental import pallas as pl
from jax.experimental.pallas import tpu as pltpu

# -------- problem configuration (small, consistent with the module) --------
B, C, H, W = 2, 64, 16, 16
RATIO = 16               # nn.Module default
CR = C // RATIO          # hidden width of the SE bottleneck MLP
HW = H * W


def se_kernel(x_ref, w1_ref, w2t_ref, o_ref):
    # x_ref  : (1, C, H*W) VMEM  -- one batch row, lane-dense (last dim = 256)
    # w1_ref : (CR, C)  fc1 weight (PyTorch Linear weight, (out=CR, in=C))
    # w2t_ref: (CR, C)  fc2 weight pre-transposed ((C, CR) -> (CR, C))
    # o_ref  : (1, C, H*W)

    # ---- squeeze: global average pool over spatial (lane reduce) ----
    pooled = jnp.mean(x_ref[...], axis=-1)                  # (1, C) f32

    # ---- excitation MLP on the VPU (tiny C/CR: no MXU round-trip) ----
    w1 = w1_ref[...]                                        # (CR, C)
    w2t = w2t_ref[...]                                      # (CR, C)

    # layer 1: h[0, r] = relu(sum_c w1[r, c] * pooled[0, c])
    h = jnp.sum(pooled[:, None, :] * w1[None, :, :], axis=-1)   # (1, CR)
    h = jnp.maximum(h, 0.0)

    # layer 2: y[0, c] = sum_r h[0, r] * w2t[r, c]
    y = jnp.sum(h[:, :, None] * w2t[None, :, :], axis=1)        # (1, C)

    scale = jax.nn.sigmoid(y)                               # (1, C)

    # ---- scale the input: re-read x_ref (don't keep x live across the MLP);
    #      full-lane, unmasked store ----
    o_ref[...] = x_ref[...] * scale[:, :, None]


def se(x, w1, w2):
    Bv, Cv, Hv, Wv = x.shape
    CRv = w1.shape[0]
    hw = Hv * Wv
    x2 = x.reshape(Bv, Cv, hw)          # contiguous reshape -> lane-dense I/O
    w2t = w2.T                          # (CR, C); tiny, done once outside

    out2 = pl.pallas_call(
        se_kernel,
        out_shape=jax.ShapeDtypeStruct((Bv, Cv, hw), x.dtype),
        grid_spec=pltpu.PrefetchScalarGridSpec(
            num_scalar_prefetch=0,
            grid=(Bv,),                 # one grid step per batch row
            in_specs=[
                pl.BlockSpec((1, Cv, hw), lambda b: (b, 0, 0)),
                pl.BlockSpec((CRv, Cv), lambda b: (0, 0)),
                pl.BlockSpec((CRv, Cv), lambda b: (0, 0)),
            ],
            out_specs=pl.BlockSpec((1, Cv, hw), lambda b: (b, 0, 0)),
        ),
        compiler_params=pltpu.CompilerParams(
            dimension_semantics=("parallel",)),   # shard batch across TCs (v7x)
    )(x2, w1, w2t)
    return out2.reshape(Bv, Cv, Hv, Wv)


def se_reference(x, w1, w2):
    """Pure-JAX reference matching the PyTorch SE forward semantics."""
    pooled = jnp.mean(x, axis=(2, 3))                       # (B, C)
    h = jnp.maximum(pooled @ w1.T, 0.0)                     # (B, CR)
    y = jax.nn.sigmoid(h @ w2.T)                            # (B, C)
    return x * y[:, :, None, None]


if __name__ == "__main__":
    key = jax.random.PRNGKey(0)
    kx, k1, k2 = jax.random.split(key, 3)

    x = jax.random.normal(kx, (B, C, H, W), dtype=jnp.float32)
    # fc1: Linear(C, C // ratio, bias=False) -> weight (CR, C)
    w1 = 0.1 * jax.random.normal(k1, (CR, C), dtype=jnp.float32)
    # fc2: Linear(C // ratio, C, bias=False) -> weight (C, CR)
    w2 = 0.1 * jax.random.normal(k2, (C, CR), dtype=jnp.float32)

    out = se(x, w1, w2)
    out = jax.block_until_ready(out)

    ref = se_reference(x, w1, w2)
    assert out.shape == x.shape and out.dtype == x.dtype
    assert jnp.allclose(out, ref, atol=1e-5, rtol=1e-5), "mismatch vs reference"

    print("KERNEL_OK")
</pallas_src>

<mosaic_0001>
module attributes {stable_mosaic.version = 11 : i64} {
  func.func @se_kernel(%arg0: i32, %arg1: memref<1x64x256xf32, #tpu.memory_space<vmem>>, %arg2: memref<4x64xf32, #tpu.memory_space<vmem>>, %arg3: memref<4x64xf32, #tpu.memory_space<vmem>>, %arg4: memref<1x64x256xf32, #tpu.memory_space<vmem>>) attributes {dimension_semantics = [#tpu.dimension_semantics<parallel>], iteration_bounds = array<i64: 2>, scalar_prefetch = 0 : i64, scratch_operands = 0 : i64, tpu.core_type = #tpu.core_type<tc>, window_params = [{transform_indices = @transform_0, window_bounds = array<i64: 1, 64, 256>}, {pipeline_mode = #tpu.pipeline_mode<synchronous>, transform_indices = @transform_1, window_bounds = array<i64: 4, 64>}, {pipeline_mode = #tpu.pipeline_mode<synchronous>, transform_indices = @transform_2, window_bounds = array<i64: 4, 64>}, {transform_indices = @transform_3, window_bounds = array<i64: 1, 64, 256>}]} {
    %c0 = arith.constant 0 : index
    %c0_0 = arith.constant 0 : index
    %c0_1 = arith.constant 0 : index
    %0 = vector.load %arg1[%c0, %c0_0, %c0_1] : memref<1x64x256xf32, #tpu.memory_space<vmem>>, vector<1x64x256xf32>
    %cst = arith.constant dense<0.000000e+00> : vector<1x64xf32>
    %1 = vector.multi_reduction <add>, %0, %cst [2] : vector<1x64x256xf32> to vector<1x64xf32>
    %cst_2 = arith.constant 2.560000e+02 : f32
    %2 = vector.broadcast %cst_2 : f32 to vector<1x64xf32>
    %3 = arith.divf %1, %2 : vector<1x64xf32>
    %c0_3 = arith.constant 0 : index
    %c0_4 = arith.constant 0 : index
    %4 = vector.load %arg2[%c0_3, %c0_4] : memref<4x64xf32, #tpu.memory_space<vmem>>, vector<4x64xf32>
    %c0_5 = arith.constant 0 : index
    %c0_6 = arith.constant 0 : index
    %5 = vector.load %arg3[%c0_5, %c0_6] : memref<4x64xf32, #tpu.memory_space<vmem>>, vector<4x64xf32>
    %6 = vector.shape_cast %3 : vector<1x64xf32> to vector<1x1x64xf32>
    %7 = vector.shape_cast %4 : vector<4x64xf32> to vector<1x4x64xf32>
    %8 = vector.broadcast %6 : vector<1x1x64xf32> to vector<1x4x64xf32>
    %9 = arith.mulf %8, %7 : vector<1x4x64xf32>
    %cst_7 = arith.constant dense<0.000000e+00> : vector<1x4xf32>
    %10 = vector.multi_reduction <add>, %9, %cst_7 [2] : vector<1x4x64xf32> to vector<1x4xf32>
    %cst_8 = arith.constant 0.000000e+00 : f32
    %11 = vector.broadcast %cst_8 : f32 to vector<1x4xf32>
    %12 = arith.maximumf %10, %11 : vector<1x4xf32>
    %13 = vector.shape_cast %12 : vector<1x4xf32> to vector<1x4x1xf32>
    %14 = vector.shape_cast %5 : vector<4x64xf32> to vector<1x4x64xf32>
    %15 = vector.broadcast %13 : vector<1x4x1xf32> to vector<1x4x64xf32>
    %16 = arith.mulf %15, %14 : vector<1x4x64xf32>
    %cst_9 = arith.constant dense<0.000000e+00> : vector<1x64xf32>
    %17 = vector.multi_reduction <add>, %16, %cst_9 [1] : vector<1x4x64xf32> to vector<1x64xf32>
    %18 = arith.negf %17 : vector<1x64xf32>
    %19 = math.exp %18 : vector<1x64xf32>
    %cst_10 = arith.constant 1.000000e+00 : f32
    %20 = vector.broadcast %cst_10 : f32 to vector<1x64xf32>
    %21 = arith.addf %20, %19 : vector<1x64xf32>
    %22 = arith.divf %20, %21 : vector<1x64xf32>
    %c0_11 = arith.constant 0 : index
    %c0_12 = arith.constant 0 : index
    %c0_13 = arith.constant 0 : index
    %23 = vector.load %arg1[%c0_11, %c0_12, %c0_13] : memref<1x64x256xf32, #tpu.memory_space<vmem>>, vector<1x64x256xf32>
    %24 = vector.shape_cast %22 : vector<1x64xf32> to vector<1x64x1xf32>
    %25 = vector.broadcast %24 : vector<1x64x1xf32> to vector<1x64x256xf32>
    %26 = arith.mulf %23, %25 : vector<1x64x256xf32>
    %c0_14 = arith.constant 0 : index
    %c0_15 = arith.constant 0 : index
    %c0_16 = arith.constant 0 : index
    %27 = vector.load %arg4[%c0_14, %c0_15, %c0_16] : memref<1x64x256xf32, #tpu.memory_space<vmem>>, vector<1x64x256xf32>
    tpu.vector_store %arg4[%c0_14, %c0_15, %c0_16], %26 {strides = array<i32>} : memref<1x64x256xf32, #tpu.memory_space<vmem>>, vector<1x64x256xf32>,
    return
  }
  func.func @transform_0(%arg0: i32) -> (i32, i32, i32) {
    %c0_i32 = arith.constant 0 : i32
    %c0_i32_0 = arith.constant 0 : i32
    %c0_i32_1 = arith.constant 0 : i32
    return %arg0, %c0_i32, %c0_i32_0 : i32, i32, i32
  }
  func.func @transform_1(%arg0: i32) -> (i32, i32) {
    %c0_i32 = arith.constant 0 : i32
    %c0_i32_0 = arith.constant 0 : i32
    %c0_i32_1 = arith.constant 0 : i32
    return %c0_i32, %c0_i32_0 : i32, i32
  }
  func.func @transform_2(%arg0: i32) -> (i32, i32) {
    %c0_i32 = arith.constant 0 : i32
    %c0_i32_0 = arith.constant 0 : i32
    %c0_i32_1 = arith.constant 0 : i32
    return %c0_i32, %c0_i32_0 : i32, i32
  }
  func.func @transform_3(%arg0: i32) -> (i32, i32, i32) {
    %c0_i32 = arith.constant 0 : i32
    %c0_i32_0 = arith.constant 0 : i32
    %c0_i32_1 = arith.constant 0 : i32
    return %arg0, %c0_i32, %c0_i32_0 : i32, i32, i32
  }
}

</mosaic_0001>

<bundles_post_ra>
// kernel: tpu_custom_call.1
= control target key start
LH: loop header
LB: loop body
LE: loop exit
PB: predicated region body
PF: predicated region fallthrough
CT: control target
= control target key end

     0   :  { %8 = vsyncpa [#allocation3], 0  ;;  %s1678_s0 = inlined_call_operand.hbm [shape: f32[2,64,256], index: 0, kind: input, shape index: {}]   ;;  %s1679_s1 = inlined_call_operand.hbm [shape: f32[4,64], index: 1, kind: input, shape index: {}]   ;;  %s1680_s2 = inlined_call_operand.hbm [shape: f32[4,64], index: 2, kind: input, shape index: {}]   ;;  %s1681_s3 = inlined_call_operand.hbm [shape: f32[2,64,256], index: 3, kind: output, shape index: {}]  }
   0x1   :  { %10 = vsyncpa [#allocation3 + $0x1], 0 }
   0x2   :  { %11 = vsyncpa [#allocation6], 0 }
   0x3   :  { %12 = vsyncpa [#allocation4], 0 }
   0x4   :  { %14 = vsyncpa [#allocation4 + $0x1], 0  ;;  %s1243_s12 = smov 0   ;;  %s1245_s13 = smov 0  }
   0x5   :  { %s1247_s14 = smov 0   ;;  %s1249_s15 = smov 0  }
   0x6 LB: > { %s1264_s16 = sadd.s32 4294967295, %s1212_s15   ;;  %s965_s17 = sadd.s32 4294967294, %s1212_s15   ;;  %s1212_s15 = sphi %s1249_s15, %s1704_s15   ;;  %s1208_s14 = sphi %s1247_s14, %s1703_s14   ;;  %s1204_s13 = sphi %s1245_s13, %s1702_s13   ;;  %s1200_s12 = sphi %s1243_s12, %s1701_s12  }
   0x7   : > { %s1268_s18 = sadd.s32 1, %s1212_s15   ;;  %s27_s19 = sadd.s32 1, %s1208_s14 }
   0x8   : > { %s24_s20 = ssub.s32 %s1212_s15, %s1268_s18  ;;  %p34_p0 = scmp.ne.s32.totalorder %s1208_s14, %s1204_s13 }
   0x9   : > { %p25_p1 = scmp.eq.s32.totalorder %s24_s20, 0  ;;  %p35_p2 = scmp.eq.s32.totalorder %s1212_s15, 0 }
   0xa   : > { %p40_p3 = scmp.ne.s32.totalorder %s1204_s13, %s1200_s12  ;;  %p1682_p4 = scmp.eq.s32.totalorder %s1264_s16, 0 }
   0xb   : > { %s1280_s21 = scalar_select %p25_p1, %s1208_s14, %s27_s19  }
   0xc   : > { %p1282_p5 = por %p35_p2, %p34_p0  ;;  %p1288_p6 = por %p1682_p4, %p40_p3 }
   0xd   : > { %p106_p7 = scmp.eq.s32.totalorder %s1264_s16, 1  ;;  %p112_p8 = scmp.eq.s32.totalorder %s965_s17, 1 }
   0xe   : > { %s1687_s23 = scalar_select %p1288_p6, 1, 0 }
   0xf   : > { %p966_p9 = scmp.ge.s32.totalorder %s1212_s15, 1  ;;  %p119_p10 = scmp.lt.s32.totalorder %s1212_s15, 3 }
  0x10   : > { %p1295_p11 = por %p106_p7, %p34_p0  ;;  %p1299_p12 = por %p112_p8, %p40_p3 }
  0x11   : > { %p1303_p13 = pnand %p966_p9, %p119_p10  ;;  %s1214_s27 = smov [#allocation5]  }
  0x12   : > { %s1688_s24 = scalar_select %p1295_p11, 1, 0 }
  0x13   : > { %s1689_s25 = scalar_select %p1299_p12, 1, 0 }
  0x14   : > { %s1690_s26 = scalar_select %p1303_p13, 1, 0 }
  0x15   : > { %p998_p2 = pneg %p1303_p13  ;;  %s132_s28 = sshll.u32 %s1214_s27, 4  ;;  %s133_s28 = int_to_ptr.vmem [resolvable:$true] %s132_s28 }
  0x16   : > { %p1015_p4 = scmp.lt.s32.totalorder %s1212_s15, 2  ;;  %p1691_p0 = scmp.eq.s32.totalorder %s1264_s16, 0 }
  0x17   : > { %s1215_s4 = smov [#allocation7]   ;;  %s1075_s6 = scalar_lea.vmem %s133_s28, 64 }
  0x18   : > { %p1313_p7 = pnand %p998_p2, %p1691_p0  ;;  %p1319_p3 = pnand %p1015_p4, %p1282_p5 }
  0x19   : > { %s143_s5 = sshll.u32 %s1215_s4, 4  ;;  %p1076_p9 = scmp.ne.s32.totalorder %s133_s28, %s1075_s6  ;;  %s144_s5 = int_to_ptr.vmem [resolvable:$true] %s143_s5 }
  0x1a   : > { %p1066_p8 = pneg %p1313_p7  ;;  %p1083_p0 = scmp.lt.s32.totalorder %s133_s28, %s133_s28 }
  0x1b   : > { %p1084_p1 = scmp.lt.s32.totalorder %s1075_s6, %s1075_s6 }
  0x1c   : > { %p1078_p10 = pnand %p1076_p9, %p1066_p8 }
  0x1d   : > { %p1085_p12 = por %p1084_p1, %p1083_p0 }
  0x1e   : > { %p1079_p2 = pneg %p1078_p10 }
  0x20   : > { %p1086_p11 = pnand %p1085_p12, %p1079_p2 }
  0x22   : > { %1089 = shalt.err (!%p1086_p11)
}
  0x23   : > { %1001 = dma.hbm_to_vmem [thread:$0]  (!%p1313_p7), %s1679_s1, 64, %s133_s28, [#allocation6]  }
  0x24   : > { %s154_s9 = sand.u32 1, %s1208_s14   ;;  %s1101_s10 = scalar_lea.vmem %s144_s5, 64 }
  0x25   : > { %p1102_p4 = scmp.ne.s32.totalorder %s144_s5, %s1101_s10  ;;  %p1109_p10 = scmp.lt.s32.totalorder %s144_s5, %s144_s5 }
  0x26   : > { %p1110_p6 = scmp.lt.s32.totalorder %s1101_s10, %s1101_s10 }
  0x27   : > { %p1104_p5 = pnand %p1102_p4, %p1066_p8 }
  0x28   : > { %p1111_p1 = por %p1110_p6, %p1109_p10 }
  0x29   : > { %p1105_p9 = pneg %p1104_p5 }
  0x2b   : > { %p1112_p12 = pnand %p1111_p1, %p1105_p9 }
  0x2d   : > { %1115 = shalt.err (!%p1112_p12)
}
  0x2e   : > { %1004 = dma.hbm_to_vmem [thread:$0]  (!%p1313_p7), %s1680_s2, 64, %s144_s5, [#allocation6]  }
  0x2f   : > { %s970_s19 = sshll.u32 %s154_s9, 7  ;;  %s984_s20 = sshll.u32 %s1212_s15, 11 }
  0x30   : > { %s1346_s28 = scalar_lea.hbm %s1678_s0, %s984_s20  ;;  %s158_s4 = scalar_lea.vmem [#allocation2], %s970_s19 }
  0x31   : > { %s165_s6 = sshll.u32 %s158_s4, 4  ;;  %s1350_s29 = scalar_lea.sflag [#allocation3], %s154_s9  ;;  %s1348_s6 = int_to_ptr.vmem [resolvable:$true] %s165_s6 }
  0x32   : > { %s1116_s7 = scalar_lea.hbm %s1346_s28, 2048  ;;  %p1118_p11 = pneg %p1319_p3 }
  0x33   : > { %p1117_p6 = scmp.ne.s32.totalorder %s1346_s28, %s1116_s7  ;;  %s1121_s10 = scalar_lea.hbm %s1678_s0, 4096 }
  0x34   : > { %p1122_p2 = scmp.lt.s32.totalorder %s1346_s28, %s1678_s0  ;;  %p1123_p0 = scmp.lt.s32.totalorder %s1121_s10, %s1116_s7 }
  0x35   : > { %p1119_p7 = pnand %p1118_p11, %p1117_p6 }
  0x36   : > { %p1124_p4 = por %p1123_p0, %p1122_p2 }
  0x37   : > { %p1120_p8 = pneg %p1119_p7 }
  0x39   : > { %p1125_p5 = pnand %p1124_p4, %p1120_p8 }
  0x3b   : > { %1128 = shalt.err (!%p1125_p5)
}
  0x3c   : > { %s1129_s9 = scalar_lea.vmem %s1348_s6, 2048  ;;  %s1216_s19 = smov [#allocation2]  }
  0x3d   : > { %p1130_p9 = scmp.ne.s32.totalorder %s1348_s6, %s1129_s9  ;;  %s1134_s20 = sshll.u32 %s1216_s19, 4  ;;  %s1135_s20 = int_to_ptr.vmem [resolvable:$false] %s1134_s20 }
  0x3e   : > { %s1136_s22 = scalar_lea.vmem %s1135_s20, 4096  ;;  %p1137_p12 = scmp.lt.s32.totalorder %s1348_s6, %s1135_s20 }
  0x3f   : > { %p1132_p10 = pnand %p1130_p9, %p1118_p11  ;;  %p1138_p6 = scmp.lt.s32.totalorder %s1136_s22, %s1129_s9 }
  0x41   : > { %p1133_p1 = pneg %p1132_p10  ;;  %p1139_p7 = por %p1138_p6, %p1137_p12 }
  0x43   : > { %p1140_p13 = pnand %p1139_p7, %p1133_p1 }
  0x45   : > { %1143 = shalt.err (!%p1140_p13)
}
  0x46   : > { %s1217_s27 = smov 256   ;;  %s1218_s4 = smov 16  }
  0x47   : > { %1008 = dma.hbm_to_vmem [thread:$0]  (!%p1319_p3), %s1346_s28, 2048, %s1348_s6, %s1350_s29, %s1217_s27, %s1217_s27, %s1218_s4  }
  0x48   : > { %p1694_p11 = scmp.ne.s32.totalorder %s1690_s26, 0 }
  0x49   : > { %s1374_s7 = sand.u32 (!%p1694_p11), 1, %s1204_s13   ;;  %p1695_p13 = scmp.ne.s32.totalorder (!%p1694_p11), %s1687_s23, 0 }
  0x4a   : > { %177 = sbr.rel (%p1694_p11) target bundleno = 781 (0x30d), region = 32  ;;  %s974_s5 = sshll.u32 (!%p1694_p11), %s1374_s7, 7 }
  0x4b   : > { %s180_s8 = scalar_lea.sflag (!%p1694_p11), [#allocation3], %s1374_s7  ;;  %s183_s10 = scalar_lea.vmem (!%p1694_p11), [#allocation2], %s974_s5 }
  0x4f   : > { %1187 = dma.done.wait (%p1695_p13), %s180_s8, 2048  }
  0x50   : > { %1189 = vsyncadd (%p1695_p13), %s180_s8, 4294965248  ;;  %p1696_p3 = scmp.eq.s32.totalorder %s1264_s16, 0 }
  0x52   : > { %1191 = dma.done.wait (%p1696_p3), [#allocation6], 128   ;;  %p1697_p8 = pmov %p1696_p3 }
  0x53   : > { %v1388_v0 = vld [vmem:[%s183_s10 + $0x20] sm:$0xff]  ;;  %v1390_v1 = vld [vmem:[%s183_s10 + $0x28] sm:$0xff]  ;;  %v1398_v5 = vld [vmem:[%s183_s10 + $0x30] sm:$0xff]  ;;  %v266_v24 = vlaneseq  ;;  %v1219_v30 = vmov 0   ;;  %vm609_vm0 = vcmask 130112   ;;  %vm616_vm1 = vcmask 195712  }
  0x54   : > { %1193 = vsyncadd (%p1697_p8), [#allocation6], 4294967168  ;;  %v1392_v2 = vld [vmem:[%s183_s10] sm:$0xff]  ;;  %v236_v3 = vadd.f32 %v1390_v1, %v1388_v0  ;;  %v1396_v4 = vld [vmem:[%s183_s10 + $0x8] sm:$0xff]  ;;  %1059 = vset.pattern.permute.xlu1 %v1219_v30  ;;  %1058 = vset.pattern.permute.xlu0 %v1219_v30  ;;  %vm623_vm2 = vcmask 261312   ;;  %vm630_vm3 = vcmask 326912  }
  0x55   : > { %v1400_v6 = vld [vmem:[%s183_s10 + $0x38] sm:$0xff]  ;;  %v230_v7 = vadd.f32 %v1396_v4, %v1392_v2  ;;  %v1404_v8 = vld [vmem:[%s183_s10 + $0x10] sm:$0xff]  ;;  %v1416_v14 = vld [vmem:[%s183_s10 + $0x40] sm:$0xff]  ;;  %v1437_v25 = vshrl.u32 %v266_v24, 7  ;;  %vm637_vm4 = vcmask 392512   ;;  %vm644_vm5 = vcmask 458112  }
  0x56   : > { %v1406_v9 = vld [vmem:[%s183_s10 + $0x18] sm:$0xff]  ;;  %237 = vadd.xlane.f32.xlu1 %v236_v3  ;;  %v239_v10 = vadd.f32 %v1400_v6, %v1398_v5  ;;  %v1412_v12 = vld [vmem:[%s183_s10 + $0x50] sm:$0xff]  ;;  %v1418_v15 = vld [vmem:[%s183_s10 + $0x48] sm:$0xff]  ;;  %vm651_vm6 = vcmask 523712   ;;  %vm770_vm7 = vcmask 1041409   ;;  %vm772_vm8 = vcmask 1042434  }
  0x57   : > { %231 = vadd.xlane.f32.xlu0 %v230_v7  ;;  %v233_v11 = vadd.f32 %v1406_v9, %v1404_v8  ;;  %v1414_v13 = vld [vmem:[%s183_s10 + $0x58] sm:$0xff]  ;;  %v242_v17 = vadd.f32 %v1418_v15, %v1416_v14  ;;  %v1424_v18 = vld [vmem:[%s183_s10 + $0x70] sm:$0xff]  ;;  %v1428_v20 = vld [vmem:[%s183_s10 + $0x60] sm:$0xff]  ;;  %v268_v26 = vsub.s32 0, %v1437_v25  ;;  %v303_v29 = vsub.s32 1, %v1437_v25  ;;  %s1596_s23 = scalar_lea.vmem [#allocation8], %s974_s5 }
  0x58   : > { %v245_v16 = vadd.f32 %v1414_v13, %v1412_v12  ;;  %v1426_v19 = vld [vmem:[%s183_s10 + $0x78] sm:$0xff]  ;;  %v1430_v21 = vld [vmem:[%s183_s10 + $0x68] sm:$0xff]  ;;  %v263_v27 = vld [vmem:[#allocation5] sm:$0xf]  ;;  %v338_v32 = vsub.s32 2, %v1437_v25  ;;  %v373_v34 = vsub.s32 3, %v1437_v25 }
  0x59   : > { %v251_v22 = vadd.f32 %v1426_v19, %v1424_v18  ;;  %v248_v23 = vadd.f32 %v1430_v21, %v1428_v20  ;;  %v269_v28 = vrot.slane %v263_v27, %v268_v26  ;;  %v304_v31 = vrot.slane %v263_v27, %v303_v29  ;;  %s985_s26 = sshll.u32 %s1264_s16, 11  ;;  %s873_s30 = sshll.u32 %s1596_s23, 4  ;;  %s1631_s30 = int_to_ptr.vmem [resolvable:$true] %s873_s30 }
  0x5a   : > { %240 = vadd.xlane.f32.xlu1 %v239_v10  ;;  %v339_v33 = vrot.slane %v263_v27, %v338_v32  ;;  %v374_v35 = vrot.slane %v263_v27, %v373_v34  ;;  %vm774_vm9 = vcmask 1043459   ;;  %vm777_vm10 = vcmask 519168   ;;  %s1629_s29 = scalar_lea.hbm %s1681_s3, %s985_s26  ;;  %s860_s16 = scalar_lea.sflag [#allocation4], %s1374_s7 }
  0x5b   : > { %234 = vadd.xlane.f32.xlu0 %v233_v11  ;;  %s1144_s11 = scalar_lea.vmem %s1631_s30, 2048  ;;  %p1698_p0 = scmp.ne.s32.totalorder %s1688_s24, 0 }
  0x5c   : > { %p1145_p2 = scmp.ne.s32.totalorder %s1631_s30, %s1144_s11  ;;  %s1220_s17 = smov [#allocation8]  }
  0x5d   : > { %s1148_s9 = sshll.u32 %s1220_s17, 4  ;;  %s1149_s9 = int_to_ptr.vmem [resolvable:$false] %s1148_s9 }
  0x5e   : > { %246 = vadd.xlane.f32.xlu1 %v245_v16  ;;  %p1146_p4 = pnand %p1145_p2, %p1698_p0  ;;  %s1150_s19 = scalar_lea.vmem %s1149_s9, 4096 }
  0x5f   : > { %243 = vadd.xlane.f32.xlu0 %v242_v17  ;;  %p1151_p9 = scmp.lt.s32.totalorder %s1631_s30, %s1149_s9  ;;  %p1152_p10 = scmp.lt.s32.totalorder %s1150_s19, %s1144_s11 }
  0x60   : > { %p1147_p5 = pneg %p1146_p4 }
  0x61   : > { %p1153_p1 = por %p1152_p10, %p1151_p9 }
  0x62   : > { %252 = vadd.xlane.f32.xlu1 %v251_v22 }
  0x63   : > { %249 = vadd.xlane.f32.xlu0 %v248_v23  ;;  %p1154_p12 = pnand %p1153_p1, %p1147_p5 }
  0x73   : > { %275 = vbcast.lane.b32.xlu1 %v269_v28, 264 }
  0x77   : > { %306 = vbcast.lane.b32.xlu1 %v304_v31, 256 }
  0x79   : > { %271 = vbcast.lane.b32.xlu0 %v269_v28, 256 }
  0x7b   : > { %310 = vbcast.lane.b32.xlu1 %v304_v31, 264 }
  0x7d   : > { %279 = vbcast.lane.b32.xlu0 %v269_v28, 272 }
  0x7f   : > { %314 = vbcast.lane.b32.xlu1 %v304_v31, 272 }
  0x81   : > { %341 = vbcast.lane.b32.xlu0 %v339_v33, 256 }
  0x83   : > { %345 = vbcast.lane.b32.xlu1 %v339_v33, 264 }
  0x85   : > { %283 = vbcast.lane.b32.xlu0 %v269_v28, 280 }
  0x87   : > { %318 = vbcast.lane.b32.xlu1 %v304_v31, 280 }
  0x89   : > { %349 = vbcast.lane.b32.xlu0 %v339_v33, 272 }
  0x8b   : > { %376 = vbcast.lane.b32.xlu1 %v374_v35, 256 }
  0x8d   : > { %380 = vbcast.lane.b32.xlu0 %v374_v35, 264 }
  0x8f   : > { %287 = vbcast.lane.b32.xlu1 %v269_v28, 288 }
  0x91   : > { %322 = vbcast.lane.b32.xlu0 %v304_v31, 288 }
  0x93   : > { %353 = vbcast.lane.b32.xlu1 %v339_v33, 280 }
  0x95   : > { %384 = vbcast.lane.b32.xlu0 %v374_v35, 272 }
  0x97   : > { %291 = vbcast.lane.b32.xlu1 %v269_v28, 296 }
  0x99   : > { %326 = vbcast.lane.b32.xlu0 %v304_v31, 296 }
  0x9b   : > { %357 = vbcast.lane.b32.xlu1 %v339_v33, 288 }
  0x9d   : > { %388 = vbcast.lane.b32.xlu0 %v374_v35, 280 }
  0x9f   : > { %295 = vbcast.lane.b32.xlu1 %v269_v28, 304 }
  0xa1   : > { %330 = vbcast.lane.b32.xlu0 %v304_v31, 304 }
  0xa3   : > { %361 = vbcast.lane.b32.xlu1 %v339_v33, 296 }
  0xa5   : > { %392 = vbcast.lane.b32.xlu0 %v374_v35, 288 }
  0xa7   : > { %299 = vbcast.lane.b32.xlu1 %v269_v28, 312 }
  0xa9   : > { %334 = vbcast.lane.b32.xlu0 %v304_v31, 312 }
  0xab   : > { %365 = vbcast.lane.b32.xlu1 %v339_v33, 304 }
  0xad   : > { %396 = vbcast.lane.b32.xlu0 %v374_v35, 296 }
  0xaf   : > { %369 = vbcast.lane.b32.xlu1 %v339_v33, 312 }
  0xb1   : > { %400 = vbcast.lane.b32.xlu0 %v374_v35, 304 }
  0xb3   : > { %404 = vbcast.lane.b32.xlu1 %v374_v35, 312 }
  0xdf   : > { %v238_v36 = vpop.xlane.xlu1 %237 }
  0xe0   : > { %v232_v37 = vpop.xlane.xlu0 %231  ;;  %v257_v53 = vmul.f32 0.00390625, %v238_v36 }
  0xe1   : > { %v255_v45 = vmul.f32 0.00390625, %v232_v37 }
  0xe3   : > { %v241_v38 = vpop.xlane.xlu1 %240 }
  0xe4   : > { %v235_v39 = vpop.xlane.xlu0 %234  ;;  %v258_v62 = vmul.f32 0.00390625, %v241_v38 }
  0xe5   : > { %v256_v44 = vmul.f32 0.00390625, %v235_v39 }
  0xe7   : > { %v247_v40 = vpop.xlane.xlu1 %246 }
  0xe8   : > { %v244_v41 = vpop.xlane.xlu0 %243  ;;  %v260_v38 = vmul.f32 0.00390625, %v247_v40 }
  0xe9   : > { %v259_v29 = vmul.f32 0.00390625, %v244_v41 }
  0xeb   : > { %v1443_v42 = vpop.xlane.xlu1 %252 }
  0xec   : > { %v1445_v43 = vpop.xlane.xlu0 %249 }
  0xef   : > { %v276_v46 = vpop.permute.xlu1 %275 }
  0xf0   : > { %v439_v47 = vmul.f32 %v276_v46, %v256_v44  ;;  %v272_v48 = vpop.permute.xlu0 %271 }
  0xf1   : > { %v438_v49 = vmul.f32 %v272_v48, %v255_v45 }
  0xf2   : > { %506 = vperm.xlu1 %1059, %v439_v47  }
  0xf3   : > { %503 = vperm.xlu0 %1058, %v438_v49   ;;  %v307_v50 = vpop.permute.xlu1 %306 }
  0xf4   : > { %v446_v51 = vmul.f32 %v307_v50, %v255_v45  ;;  %v280_v52 = vpop.permute.xlu0 %279  ;;  %v261_v50 = vmul.f32 0.00390625, %v1445_v43 }
  0xf5   : > { %v440_v55 = vmul.f32 %v280_v52, %v257_v53 }
  0xf6   : > { %527 = vperm.xlu1 %1059, %v446_v51  }
  0xf7   : > { %v311_v54 = vpop.permute.xlu1 %310 }
  0xf8   : > { %v447_v56 = vmul.f32 %v311_v54, %v256_v44  ;;  %v342_v57 = vpop.permute.xlu0 %341 }
  0xf9   : > { %v454_v59 = vmul.f32 %v342_v57, %v255_v45 }
  0xfa   : > { %530 = vperm.xlu0 %1058, %v447_v56   ;;  %509 = vperm.xlu1 %1059, %v440_v55  }
  0xfb   : > { %v315_v58 = vpop.permute.xlu1 %314 }
  0xfc   : > { %v448_v60 = vmul.f32 %v315_v58, %v257_v53  ;;  %v284_v61 = vpop.permute.xlu0 %283  ;;  %v262_v58 = vmul.f32 0.00390625, %v1443_v42 }
  0xfd   : > { %v441_v3 = vmul.f32 %v284_v61, %v258_v62 }
  0xfe   : > { %533 = vperm.xlu0 %1058, %v448_v60   ;;  %551 = vperm.xlu1 %1059, %v454_v59  }
  0xff   : > { %v346_v63 = vpop.permute.xlu1 %345 }
 0x100   : > { %v455_v7 = vmul.f32 %v346_v63, %v256_v44  ;;  %v350_v10 = vpop.permute.xlu0 %349 }
 0x101   : > { %v456_v16 = vmul.f32 %v350_v10, %v257_v53 }
 0x102   : > { %554 = vperm.xlu0 %1058, %v455_v7   ;;  %512 = vperm.xlu1 %1059, %v441_v3  }
 0x103   : > { %v319_v11 = vpop.permute.xlu1 %318 }
 0x104   : > { %v449_v17 = vmul.f32 %v319_v11, %v258_v62  ;;  %v381_v22 = vpop.permute.xlu0 %380 }
 0x105   : > { %v463_v26 = vmul.f32 %v381_v22, %v256_v44 }
 0x106   : > { %536 = vperm.xlu0 %1058, %v449_v17   ;;  %557 = vperm.xlu1 %1059, %v456_v16  }
 0x107   : > { %v377_v23 = vpop.permute.xlu1 %376 }
 0x108   : > { %v462_v27 = vmul.f32 %v377_v23, %v255_v45  ;;  %v323_v28 = vpop.permute.xlu0 %322 }
 0x109   : > { %v450_v31 = vmul.f32 %v323_v28, %v259_v29 }
 0x10a   : > { %575 = vperm.xlu0 %1058, %v462_v27   ;;  %578 = vperm.xlu1 %1059, %v463_v26  }
 0x10b   : > { %v288_v30 = vpop.permute.xlu1 %287 }
 0x10c   : > { %v442_v32 = vmul.f32 %v288_v30, %v259_v29  ;;  %v385_v33 = vpop.permute.xlu0 %384 }
 0x10d   : > { %v464_v35 = vmul.f32 %v385_v33, %v257_v53 }
 0x10e   : > { %515 = vperm.xlu0 %1058, %v442_v32   ;;  %539 = vperm.xlu1 %1059, %v450_v31  }
 0x10f   : > { %v354_v34 = vpop.permute.xlu1 %353 }
 0x110   : > { %v457_v36 = vmul.f32 %v354_v34, %v258_v62  ;;  %v327_v37 = vpop.permute.xlu0 %326 }
 0x111   : > { %v451_v44 = vmul.f32 %v327_v37, %v260_v38 }
 0x112   : > { %560 = vperm.xlu0 %1058, %v457_v36   ;;  %581 = vperm.xlu1 %1059, %v464_v35  }
 0x113   : > { %v292_v39 = vpop.permute.xlu1 %291 }
 0x114   : > { %v443_v45 = vmul.f32 %v292_v39, %v260_v38  ;;  %v389_v46 = vpop.permute.xlu0 %388 }
 0x115   : > { %v465_v47 = vmul.f32 %v389_v46, %v258_v62 }
 0x116   : > { %518 = vperm.xlu0 %1058, %v443_v45   ;;  %542 = vperm.xlu1 %1059, %v451_v44  }
 0x117   : > { %v358_v41 = vpop.permute.xlu1 %357 }
 0x118   : > { %v458_v48 = vmul.f32 %v358_v41, %v259_v29  ;;  %v331_v49 = vpop.permute.xlu0 %330  ;;  %v599_v41 = vand.u32 127, %v266_v24 }
 0x119   : > { %v452_v52 = vmul.f32 %v331_v49, %v261_v50 }
 0x11a   : > { %563 = vperm.xlu0 %1058, %v458_v48   ;;  %584 = vperm.xlu1 %1059, %v465_v47   ;;  %v604_v49 = vadd.s32 4294967288, %v599_v41  ;;  %v632_v24 = vadd.s32 4294967256, %v599_v41 }
 0x11b   : > { %v296_v51 = vpop.permute.xlu1 %295 }
 0x11c   : > { %v444_v53 = vmul.f32 %v296_v51, %v261_v50  ;;  %v393_v40 = vpop.permute.xlu0 %392  ;;  %v618_v51 = vadd.s32 4294967272, %v599_v41 }
 0x11d   : > { %v466_v55 = vmul.f32 %v393_v40, %v259_v29  ;;  %v607_v40 = vsub.s32 %v604_v49, %v1437_v25 }
 0x11e   : > { %521 = vperm.xlu0 %1058, %v444_v53   ;;  %545 = vperm.xlu1 %1059, %v452_v52  }
 0x11f   : > { %v362_v54 = vpop.permute.xlu1 %361 }
 0x120   : > { %v459_v56 = vmul.f32 %v362_v54, %v260_v38  ;;  %v335_v57 = vpop.permute.xlu0 %334  ;;  %v602_v54 = vsub.s32 %v599_v41, %v1437_v25 }
 0x121   : > { %v453_v60 = vmul.f32 %v335_v57, %v262_v58  ;;  %v1498_v57 = vsub.s32 %v618_v51, %v1437_v25 }
 0x122   : > { %566 = vperm.xlu0 %1058, %v459_v56   ;;  %587 = vperm.xlu1 %1059, %v466_v55   ;;  %v625_v55 = vadd.s32 4294967264, %v599_v41 }
 0x123   : > { %v300_v59 = vpop.permute.xlu1 %299 }
 0x124   : > { %v445_v61 = vmul.f32 %v300_v59, %v262_v58  ;;  %v397_v43 = vpop.permute.xlu0 %396 }
 0x125   : > { %v467_v63 = vmul.f32 %v397_v43, %v260_v38 }
 0x126   : > { %524 = vperm.xlu0 %1058, %v445_v61   ;;  %548 = vperm.xlu1 %1059, %v453_v60   ;;  %v646_v61 = vadd.s32 4294967240, %v599_v41 }
 0x127   : > { %v366_v62 = vpop.permute.xlu1 %365 }
 0x128   : > { %v460_v3 = vmul.f32 %v366_v62, %v261_v50  ;;  %v401_v7 = vpop.permute.xlu0 %400 }
 0x129   : > { %v468_v11 = vmul.f32 %v401_v7, %v261_v50  ;;  %v611_v50 = vadd.s32 4294967280, %v599_v41 }
 0x12a   : > { %569 = vperm.xlu0 %1058, %v460_v3   ;;  %590 = vperm.xlu1 %1059, %v467_v63   ;;  %v1506_v63 = vsub.s32 %v625_v55, %v1437_v25 }
 0x12b   : > { %v370_v10 = vpop.permute.xlu1 %369  ;;  %v1495_v56 = vsub.s32 %v611_v50, %v1437_v25 }
 0x12c   : > { %v461_v16 = vmul.f32 %v370_v10, %v262_v58 }
 0x12e   : > { %572 = vperm.xlu0 %1058, %v461_v16   ;;  %593 = vperm.xlu1 %1059, %v468_v11   ;;  %v1512_v11 = vsub.s32 %v632_v24, %v1437_v25 }
 0x12f   : > { %v405_v42 = vpop.permute.xlu1 %404 }
 0x130   : > { %v469_v17 = vmul.f32 %v405_v42, %v262_v58  ;;  %v639_v58 = vadd.s32 4294967248, %v599_v41 }
 0x132   : > { %596 = vperm.xlu0 %1058, %v469_v17  }
 0x16d   : > { %v1449_v22 = vpop.permute.xlu1 %506 }
 0x16e   : > { %v504_v23 = vpop.permute.xlu0 %503  ;;  %v608_v43 = vrot.slane %v1449_v22, %v607_v40  ;;  %v1521_v22 = vsub.s32 %v639_v58, %v1437_v25 }
 0x16f   : > { %v603_v62 = vrot.slane %v504_v23, %v602_v54 }
 0x171   : > { %v1451_v26 = vpop.permute.xlu1 %527  ;;  %v610_v41 = vsel %vm609_vm0, %v608_v43, %v603_v62 }
 0x172   : > { %v656_v23 = vrot.slane %v1451_v26, %v602_v54 }
 0x175   : > { %v1453_v27 = vpop.permute.xlu1 %509  ;;  %v1455_v28 = vpop.permute.xlu0 %530 }
 0x176   : > { %v615_v3 = vrot.slane %v1453_v27, %v1495_v56  ;;  %v660_v7 = vrot.slane %v1455_v28, %v607_v40 }
 0x178   : > { %v661_v50 = vsel %vm609_vm0, %v660_v7, %v656_v23 }
 0x179   : > { %v1457_v29 = vpop.permute.xlu1 %551  ;;  %v1459_v30 = vpop.permute.xlu0 %533 }
 0x17a   : > { %v665_v16 = vrot.slane %v1459_v30, %v1495_v56  ;;  %v695_v27 = vrot.slane %v1457_v29, %v602_v54  ;;  %v617_v29 = vsel %vm616_vm1, %v615_v3, %v610_v41 }
 0x17c   : > { %v666_v51 = vsel %vm616_vm1, %v665_v16, %v661_v50 }
 0x17d   : > { %v1461_v31 = vpop.permute.xlu1 %512  ;;  %v555_v32 = vpop.permute.xlu0 %554 }
 0x17e   : > { %v699_v10 = vrot.slane %v555_v32, %v607_v40  ;;  %v622_v42 = vrot.slane %v1461_v31, %v1498_v57  ;;  %v1528_v32 = vsub.s32 %v646_v61, %v1437_v25 }
 0x180   : > { %v624_v55 = vsel %vm623_vm2, %v622_v42, %v617_v29 }
 0x181   : > { %v1463_v33 = vpop.permute.xlu1 %557  ;;  %v1465_v34 = vpop.permute.xlu0 %536 }
 0x182   : > { %v704_v17 = vrot.slane %v1463_v33, %v1495_v56  ;;  %v670_v28 = vrot.slane %v1465_v34, %v1498_v57  ;;  %v700_v34 = vsel %vm609_vm0, %v699_v10, %v695_v27 }
 0x185   : > { %v1467_v35 = vpop.permute.xlu1 %578  ;;  %v1469_v36 = vpop.permute.xlu0 %575 }
 0x186   : > { %v738_v33 = vrot.slane %v1467_v35, %v607_v40  ;;  %v734_v49 = vrot.slane %v1469_v36, %v602_v54  ;;  %v705_v35 = vsel %vm616_vm1, %v704_v17, %v700_v34  ;;  %v671_v36 = vsel %vm623_vm2, %v670_v28, %v666_v51 }
 0x188   : > { %v739_v58 = vsel %vm609_vm0, %v738_v33, %v734_v49 }
 0x189   : > { %v1471_v37 = vpop.permute.xlu1 %539  ;;  %v1473_v38 = vpop.permute.xlu0 %515 }
 0x18a   : > { %v675_v26 = vrot.slane %v1471_v37, %v1506_v63  ;;  %v629_v25 = vrot.slane %v1473_v38, %v1506_v63 }
 0x18c   : > { %v676_v61 = vsel %vm630_vm3, %v675_v26, %v671_v36  ;;  %v264_v36 = vld [vmem:[#allocation7] sm:$0xf] }
 0x18d   : > { %v1475_v39 = vpop.permute.xlu1 %581  ;;  %v1477_v44 = vpop.permute.xlu0 %560 }
 0x18e   : > { %v743_v37 = vrot.slane %v1475_v39, %v1495_v56  ;;  %v709_v40 = vrot.slane %v1477_v44, %v1498_v57  ;;  %v631_v39 = vsel %vm630_vm3, %v629_v25, %v624_v55 }
 0x190   : > { %v744_v10 = vsel %vm616_vm1, %v743_v37, %v739_v58  ;;  %v710_v16 = vsel %vm623_vm2, %v709_v40, %v705_v35 }
 0x191   : > { %v1479_v45 = vpop.permute.xlu1 %542  ;;  %v1481_v46 = vpop.permute.xlu0 %518 }
 0x192   : > { %v680_v54 = vrot.slane %v1479_v45, %v1512_v11  ;;  %v636_v43 = vrot.slane %v1481_v46, %v1512_v11 }
 0x194   : > { %v638_v17 = vsel %vm637_vm4, %v636_v43, %v631_v39 }
 0x195   : > { %v1484_v47 = vpop.permute.xlu1 %584  ;;  %v1486_v48 = vpop.permute.xlu0 %563 }
 0x196   : > { %v714_v62 = vrot.slane %v1486_v48, %v1506_v63  ;;  %v748_v3 = vrot.slane %v1484_v47, %v1498_v57 }
 0x198   : > { %v715_v47 = vsel %vm630_vm3, %v714_v62, %v710_v16 }
 0x199   : > { %v1488_v52 = vpop.permute.xlu1 %545  ;;  %v1490_v53 = vpop.permute.xlu0 %521 }
 0x19a   : > { %v685_v44 = vrot.slane %v1488_v52, %v1521_v22  ;;  %v643_v45 = vrot.slane %v1490_v53, %v1521_v22  ;;  %v681_v52 = vsel %vm637_vm4, %v680_v54, %v676_v61 }
 0x19c   : > { %v686_v27 = vsel %vm644_vm5, %v685_v44, %v681_v52  ;;  %v645_v28 = vsel %vm644_vm5, %v643_v45, %v638_v17 }
 0x19d   : > { %v1500_v59 = vpop.permute.xlu1 %587  ;;  %v1502_v60 = vpop.permute.xlu0 %566 }
 0x19e   : > { %v719_v56 = vrot.slane %v1502_v60, %v1512_v11  ;;  %v753_v53 = vrot.slane %v1500_v59, %v1506_v63  ;;  %v749_v59 = vsel %vm623_vm2, %v748_v3, %v744_v10 }
 0x1a1   : > { %v549_v30 = vpop.permute.xlu1 %548  ;;  %v525_v31 = vpop.permute.xlu0 %524 }
 0x1a2   : > { %v690_v7 = vrot.slane %v549_v30, %v1528_v32  ;;  %v650_v46 = vrot.slane %v525_v31, %v1528_v32  ;;  %v720_v30 = vsel %vm637_vm4, %v719_v56, %v715_v47 }
 0x1a4   : > { %v691_v63 = vsel %vm651_vm6, %v690_v7, %v686_v27  ;;  %v652_v41 = vsel %vm651_vm6, %v650_v46, %v645_v28 }
 0x1a5   : > { %v591_v24 = vpop.permute.xlu1 %590  ;;  %v570_v38 = vpop.permute.xlu0 %569  ;;  %v771_v34 = vsel %vm770_vm7, %v691_v63, %v652_v41 }
 0x1a6   : > { %v724_v48 = vrot.slane %v570_v38, %v1521_v22  ;;  %v758_v57 = vrot.slane %v591_v24, %v1512_v11  ;;  %v754_v11 = vsel %vm630_vm3, %v753_v53, %v749_v59 }
 0x1a8   : > { %v725_v33 = vsel %vm644_vm5, %v724_v48, %v720_v30  ;;  %v759_v29 = vsel %vm637_vm4, %v758_v57, %v754_v11 }
 0x1a9   : > { %v594_v42 = vpop.permute.xlu1 %593  ;;  %v573_v60 = vpop.permute.xlu0 %572 }
 0x1aa   : > { %v729_v23 = vrot.slane %v573_v60, %v1528_v32  ;;  %v763_v31 = vrot.slane %v594_v42, %v1521_v22 }
 0x1ac   : > { %v730_v49 = vsel %vm651_vm6, %v729_v23, %v725_v33  ;;  %v764_v22 = vsel %vm644_vm5, %v763_v31, %v759_v29 }
 0x1ad   : > { %v597_v26 = vpop.permute.xlu0 %596  ;;  %v773_v51 = vsel %vm772_vm8, %v730_v49, %v771_v34 }
 0x1ae   : > { %v768_v50 = vrot.slane %v597_v26, %v1528_v32 }
 0x1b0   : > { %v769_v25 = vsel %vm651_vm6, %v768_v50, %v764_v22 }
 0x1b1   : > { %v775_v55 = vsel %vm774_vm9, %v769_v25, %v773_v51 }
 0x1b2   : > { %v778_v35 = vsel %vm777_vm10, %v775_v55, 0.0 }
 0x1b3   : > { %779 = vadd.xlane.f32.xlu1 %v778_v35 }
 0x23c   : > { %v780_v37 = vpop.xlane.xlu1 %779 }
 0x23d   : > { %v781_v40 = vmax.f32 %v780_v37, 0.0 }
 0x23f   : > { %v782_v54 = vmul.f32 %v781_v40, %v264_v36 }
 0x241   : > { %v783_v24 = vsel %vm777_vm10, %v782_v54, 0.0 }
 0x242   : > { %v784_v38 = vrot.slane %v783_v24, 4 }
 0x244   : > { %v785_v58 = vadd.f32 %v784_v38, %v783_v24 }
 0x246   : > { %v786_v32 = vrot.slane %v785_v58, 2 }
 0x248   : > { %v787_v61 = vadd.f32 %v786_v32, %v785_v58 }
 0x24a   : > { %v788_v43 = vrot.slane %v787_v61, 1 }
 0x24c   : > { %v789_v62 = vadd.f32 %v788_v43, %v787_v61 }
 0x24e   : > { %v978_v39 = vmul.f32 -1.442695, %v789_v62 }
 0x250   : > { %1060 = vpow2.f32 %v978_v39 }
 0x25d   : > { %v1061_v44 = vpop.eup %1060 }
 0x25e   : > { %v793_v45 = vadd.f32 1.0, %v1061_v44 }
 0x260   : > { %1062 = vrcp.f32 %v793_v45 }
 0x26d   : > { %v1063_v56 = vpop.eup %1062 }
 0x26e   : > { %797 = vbcast.lane.b32.xlu0 %v1063_v56, 256 }
 0x272   : > { %801 = vbcast.lane.b32.xlu0 %v1063_v56, 264 }
 0x276   : > { %805 = vbcast.lane.b32.xlu0 %v1063_v56, 272 }
 0x27a   : > { %809 = vbcast.lane.b32.xlu0 %v1063_v56, 280 }
 0x27e   : > { %813 = vbcast.lane.b32.xlu0 %v1063_v56, 288 }
 0x282   : > { %817 = vbcast.lane.b32.xlu0 %v1063_v56, 296 }
 0x286   : > { %821 = vbcast.lane.b32.xlu0 %v1063_v56, 304 }
 0x28a   : > { %825 = vbcast.lane.b32.xlu0 %v1063_v56, 312 }
 0x2e0   : > { %v798_v3 = vpop.permute.xlu0 %797 }
 0x2e1   : > { %v827_v7 = vmul.f32 %v798_v3, %v1392_v2  ;;  %v828_v46 = vmul.f32 %v798_v3, %v1396_v4 }
 0x2e3   : > { %843 = vst [vmem:[%s1596_s23] sm:$0xff] %v827_v7  ;;  %844 = vst [vmem:[%s1596_s23 + $0x8] sm:$0xff] %v828_v46 }
 0x2e4   : > { %v802_v48 = vpop.permute.xlu0 %801 }
 0x2e5   : > { %v829_v10 = vmul.f32 %v802_v48, %v1404_v8  ;;  %v830_v2 = vmul.f32 %v802_v48, %v1406_v9 }
 0x2e7   : > { %845 = vst [vmem:[%s1596_s23 + $0x10] sm:$0xff] %v829_v10  ;;  %846 = vst [vmem:[%s1596_s23 + $0x18] sm:$0xff] %v830_v2 }
 0x2e8   : > { %v806_v4 = vpop.permute.xlu0 %805 }
 0x2e9   : > { %v831_v16 = vmul.f32 %v806_v4, %v1388_v0  ;;  %v832_v52 = vmul.f32 %v806_v4, %v1390_v1 }
 0x2eb   : > { %847 = vst [vmem:[%s1596_s23 + $0x20] sm:$0xff] %v831_v16  ;;  %848 = vst [vmem:[%s1596_s23 + $0x28] sm:$0xff] %v832_v52 }
 0x2ec   : > { %v810_v53 = vpop.permute.xlu0 %809 }
 0x2ed   : > { %v833_v42 = vmul.f32 %v810_v53, %v1398_v5  ;;  %v834_v8 = vmul.f32 %v810_v53, %v1400_v6 }
 0x2ef   : > { %849 = vst [vmem:[%s1596_s23 + $0x30] sm:$0xff] %v833_v42  ;;  %850 = vst [vmem:[%s1596_s23 + $0x38] sm:$0xff] %v834_v8 }
 0x2f0   : > { %v814_v9 = vpop.permute.xlu0 %813 }
 0x2f1   : > { %v835_v0 = vmul.f32 %v814_v9, %v1416_v14  ;;  %v836_v1 = vmul.f32 %v814_v9, %v1418_v15 }
 0x2f3   : > { %851 = vst [vmem:[%s1596_s23 + $0x40] sm:$0xff] %v835_v0  ;;  %852 = vst [vmem:[%s1596_s23 + $0x48] sm:$0xff] %v836_v1 }
 0x2f4   : > { %v818_v60 = vpop.permute.xlu0 %817 }
 0x2f5   : > { %v837_v17 = vmul.f32 %v818_v60, %v1412_v12  ;;  %v838_v5 = vmul.f32 %v818_v60, %v1414_v13 }
 0x2f7   : > { %853 = vst [vmem:[%s1596_s23 + $0x50] sm:$0xff] %v837_v17  ;;  %854 = vst [vmem:[%s1596_s23 + $0x58] sm:$0xff] %v838_v5 }
 0x2f8   : > { %v822_v6 = vpop.permute.xlu0 %821 }
 0x2f9   : > { %v839_v47 = vmul.f32 %v822_v6, %v1428_v20  ;;  %v840_v14 = vmul.f32 %v822_v6, %v1430_v21 }
 0x2fb   : > { %855 = vst [vmem:[%s1596_s23 + $0x60] sm:$0xff] %v839_v47  ;;  %856 = vst [vmem:[%s1596_s23 + $0x68] sm:$0xff] %v840_v14 }
 0x2fc   : > { %v826_v15 = vpop.permute.xlu0 %825 }
 0x2fd   : > { %v841_v12 = vmul.f32 %v826_v15, %v1424_v18  ;;  %v842_v13 = vmul.f32 %v826_v15, %v1426_v19 }
 0x2ff   : > { %857 = vst [vmem:[%s1596_s23 + $0x70] sm:$0xff] %v841_v12  ;;  %858 = vst [vmem:[%s1596_s23 + $0x78] sm:$0xff] %v842_v13 }
 0x300   : > { %1157 = shalt.err (!%p1154_p12)
}
 0x301   : > { %s1158_s20 = scalar_lea.hbm %s1629_s29, 2048  ;;  %s1162_s4 = scalar_lea.hbm %s1681_s3, 4096 }
 0x302   : > { %p1159_p6 = scmp.ne.s32.totalorder %s1629_s29, %s1158_s20  ;;  %p1163_p13 = scmp.lt.s32.totalorder %s1629_s29, %s1681_s3 }
 0x303   : > { %p1164_p3 = scmp.lt.s32.totalorder %s1162_s4, %s1158_s20 }
 0x304   : > { %p1160_p7 = pnand %p1159_p6, %p1698_p0 }
 0x305   : > { %p1165_p8 = por %p1164_p3, %p1163_p13 }
 0x306   : > { %p1161_p11 = pneg %p1160_p7 }
 0x308   : > { %p1166_p2 = pnand %p1165_p8, %p1161_p11 }
 0x30a   : > { %1169 = shalt.err (!%p1166_p2)
}
 0x30b   : > { %s1221_s10 = smov 256   ;;  %s1222_s23 = smov 16  }
 0x30c   : > { %996 = dma.vmem_to_hbm [thread:$0]  (%p1698_p0), %s1631_s30, 2048, %s1629_s29, %s860_s16, %s1221_s10, %s1221_s10, %s1222_s23  }
 0x30d PF: > { %s888_s26 = sand.u32 1, %s1200_s12   ;;  %p1699_p4 = scmp.ne.s32.totalorder %s1689_s25, 0 }
 0x30e   : > { %p1700_p5 = scmp.ge.s32.totalorder %s1212_s15, 2  ;;  %s889_s28 = scalar_lea.sflag [#allocation4], %s888_s26 }
 0x310   : > { %p1010_p9 = pnand %p1700_p5, %p1699_p4 }
 0x312   : > { %p1011_p10 = pneg %p1010_p9 }
 0x314   : > { %1195 = dma.done.wait (%p1011_p10), %s889_s28, 2048  }
 0x315   : > { %1197 = vsyncadd (%p1011_p10), %s889_s28, 4294965248  ;;  %p17_p1 = scmp.ge.s32.totalorder %s1268_s18, 4   ;;  %s1701_s12 = smov %s1204_s13 }
 0x316   : > { %s1702_s13 = smov %s1208_s14  ;;  %s1703_s14 = smov %s1280_s21 }
 0x317   : > { %s1704_s15 = smov %s1268_s18  ;;  %19 = sbr.rel (!%p17_p1) target bundleno = 6 (0x6), region = 85 }
 0x31c   :  { %894 = vsyncpa [#allocation3], 1 }
 0x31d   :  { %896 = vsyncpa [#allocation3 + $0x1], 1 }
 0x31e   :  { %897 = vsyncpa [#allocation6], 1 }
 0x31f   :  { %898 = vsyncpa [#allocation4], 1 }
 0x320   :  { %900 = vsyncpa [#allocation4 + $0x1], 1 }

</bundles_post_ra>
